<compile_context>
chip_gen: v5e
topology: v5e:2x2
jax: 0.10.0
libtpu: 0.0.40
codegen_flags: <defaults>
</compile_context>

<pallas_src>
import jax
import jax.numpy as jnp
from jax.experimental import pallas as pl
from jax.experimental.pallas import tpu as pltpu


def _add_relu_conv1x1_kernel(a_ref, b_ref, w_ref, o_ref, x_ref):
    # a_ref, b_ref : (1, C_in, HW) activation blocks (constant in the j axis)
    # w_ref        : (C_out, C_in) bf16 weight, resident for the whole grid
    # o_ref        : (1, ct, HW)   output tile for C_out rows [j*ct, (j+1)*ct)
    # x_ref        : (C_in, HW)    bf16 VMEM scratch holding relu(a+b)
    j = pl.program_id(1)
    ct = o_ref.shape[1]  # static C_out tile size

    @pl.when(j == 0)
    def _():
        # Fused add + ReLU in f32 on the VPU, stored once per image as bf16.
        x_ref[...] = jnp.maximum(a_ref[0] + b_ref[0], 0.0).astype(jnp.bfloat16)

    # Slice this tile's weight rows out of the resident weight and hit the MXU.
    row0 = pl.multiple_of(j * ct, ct)
    w_tile = w_ref[pl.ds(row0, ct), :]
    o_ref[0] = jnp.dot(w_tile, x_ref[...],
                       preferred_element_type=jnp.float32).astype(o_ref.dtype)


def add_relu_conv1x1(x47, x55, weight):
    """x47, x55: (N, C_in, H, W) float32.  weight: (C_out, C_in, 1, 1) float32."""
    N, C_in, H, W = x47.shape
    C_out = weight.shape[0]
    HW = H * W

    # NCHW -> (N, C_in, H*W): pure reshape, no transpose / extra HBM traffic.
    a = x47.reshape(N, C_in, HW)
    b = x55.reshape(N, C_in, HW)
    # (C_out, C_in) weight, cast once to bf16 (halves weight DMA, native MXU path).
    w2d = weight[:, :, 0, 0].astype(jnp.bfloat16)

    # Split C_out into 2 tiles when the split keeps (8,128)-friendly shapes, so
    # the writeback of tile 0 overlaps the compute of tile 1.  More tiles would
    # only add ~0.35 us/step of grid overhead (kernel is HBM-bound, not MXU).
    n_j = 2 if (C_out % 2 == 0 and (C_out // 2) % 8 == 0) else 1
    ct = C_out // n_j

    flops = 2 * N * C_out * C_in * HW
    bytes_accessed = (2 * N * C_in * HW * 4            # read a, b (f32)
                      + C_out * C_in * 2               # read weight (bf16), once
                      + N * C_out * HW * 4)            # write out (f32)

    out_flat = pl.pallas_call(
        _add_relu_conv1x1_kernel,
        out_shape=jax.ShapeDtypeStruct((N, C_out, HW), x47.dtype),
        grid_spec=pltpu.PrefetchScalarGridSpec(
            num_scalar_prefetch=0,
            grid=(N, n_j),
            in_specs=[
                # Activations: constant in j -> DMA'd once per image.
                pl.BlockSpec((1, C_in, HW), lambda n, j: (n, 0, 0)),
                pl.BlockSpec((1, C_in, HW), lambda n, j: (n, 0, 0)),
                # Full weight, constant index_map -> fetched once for the grid.
                pl.BlockSpec((C_out, C_in), lambda n, j: (0, 0)),
            ],
            out_specs=pl.BlockSpec((1, ct, HW), lambda n, j: (n, j, 0)),
            scratch_shapes=[pltpu.VMEM((C_in, HW), jnp.bfloat16)],
        ),
        compiler_params=pltpu.CompilerParams(
            dimension_semantics=("parallel", "arbitrary"),
            vmem_limit_bytes=32 * 1024 * 1024),
        cost_estimate=pl.CostEstimate(
            flops=flops, transcendentals=0, bytes_accessed=bytes_accessed),
    )(a, b, w2d)

    # (N, C_out, H*W) -> NCHW, again a pure reshape.
    return out_flat.reshape(N, C_out, H, W)


if __name__ == "__main__":
    # Small shapes consistent with the module (production: N=1, C=512, H=W=28).
    # C=128 exercises the 2-way C_out split (tiles of 64); N=2 exercises the
    # batch grid axis.
    N, C, H, W = 2, 128, 8, 8

    key = jax.random.PRNGKey(0)
    k1, k2, k3 = jax.random.split(key, 3)
    x47 = jax.random.normal(k1, (N, C, H, W), dtype=jnp.float32)
    x55 = jax.random.normal(k2, (N, C, H, W), dtype=jnp.float32)
    # Deterministic weight for Conv2d(C, C, kernel_size=1, bias=False).
    weight = jax.random.normal(k3, (C, C, 1, 1), dtype=jnp.float32) * 0.05

    out = add_relu_conv1x1(x47, x55, weight)
    jax.block_until_ready(out)

    # Sanity check vs. plain-JAX f32 reference (tolerance loosened for the
    # bf16-input / f32-accumulate MXU path).
    ref = jnp.einsum("nchw,oc->nohw",
                     jnp.maximum(x47 + x55, 0.0),
                     weight[:, :, 0, 0])
    assert out.shape == (N, C, H, W)
    assert jnp.allclose(out, ref, atol=3e-2, rtol=3e-2)

    print("KERNEL_OK")
</pallas_src>

<mosaic_0001>
module attributes {stable_mosaic.version = 11 : i64} {
  func.func @_add_relu_conv1x1_kernel(%arg0: i32, %arg1: i32, %arg2: memref<1x128x64xf32, #tpu.memory_space<vmem>>, %arg3: memref<1x128x64xf32, #tpu.memory_space<vmem>>, %arg4: memref<128x128xbf16, #tpu.memory_space<vmem>>, %arg5: memref<1x64x64xf32, #tpu.memory_space<vmem>>, %arg6: memref<128x64xbf16, #tpu.memory_space<vmem>>) attributes {dimension_semantics = [#tpu.dimension_semantics<parallel>, #tpu.dimension_semantics<arbitrary>], iteration_bounds = array<i64: 2, 2>, scalar_prefetch = 0 : i64, scratch_operands = 1 : i64, tpu.core_type = #tpu.core_type<tc>, window_params = [{transform_indices = @transform_0, window_bounds = array<i64: 1, 128, 64>}, {transform_indices = @transform_1, window_bounds = array<i64: 1, 128, 64>}, {pipeline_mode = #tpu.pipeline_mode<synchronous>, transform_indices = @transform_2, window_bounds = array<i64: 128, 128>}, {transform_indices = @transform_3, window_bounds = array<i64: 1, 64, 64>}]} {
    %c0_i32 = arith.constant 0 : i32
    %0 = arith.cmpi eq, %arg1, %c0_i32 : i32
    %1 = arith.extui %0 : i1 to i32
    %c0_i32_0 = arith.constant 0 : i32
    %2 = arith.cmpi ne, %1, %c0_i32_0 : i32
    scf.if %2 {
      %c0_6 = arith.constant 0 : index
      %c0_7 = arith.constant 0 : index
      %c0_8 = arith.constant 0 : index
      %12 = vector.load %arg2[%c0_6, %c0_7, %c0_8] : memref<1x128x64xf32, #tpu.memory_space<vmem>>, vector<1x128x64xf32>
      %13 = vector.shape_cast %12 : vector<1x128x64xf32> to vector<128x64xf32>
      %c0_9 = arith.constant 0 : index
      %c0_10 = arith.constant 0 : index
      %c0_11 = arith.constant 0 : index
      %14 = vector.load %arg3[%c0_9, %c0_10, %c0_11] : memref<1x128x64xf32, #tpu.memory_space<vmem>>, vector<1x128x64xf32>
      %15 = vector.shape_cast %14 : vector<1x128x64xf32> to vector<128x64xf32>
      %16 = arith.addf %13, %15 : vector<128x64xf32>
      %cst_12 = arith.constant 0.000000e+00 : f32
      %17 = vector.broadcast %cst_12 : f32 to vector<128x64xf32>
      %18 = arith.maximumf %16, %17 : vector<128x64xf32>
      %19 = arith.truncf %18 : vector<128x64xf32> to vector<128x64xbf16>
      %c0_13 = arith.constant 0 : index
      %c0_14 = arith.constant 0 : index
      %20 = vector.load %arg6[%c0_13, %c0_14] : memref<128x64xbf16, #tpu.memory_space<vmem>>, vector<128x64xbf16>
      tpu.vector_store %arg6[%c0_13, %c0_14], %19 {strides = array<i32>} : memref<128x64xbf16, #tpu.memory_space<vmem>>, vector<128x64xbf16>,
    } else {
    }
    %c64_i32 = arith.constant 64 : i32
    %3 = arith.muli %arg1, %c64_i32 : i32
    %4 = tpu.assume_multiple %3, 64 : i32
    %5 = arith.index_cast %4 : i32 to index
    %c0 = arith.constant 0 : index
    %6 = vector.load %arg4[%5, %c0] : memref<128x128xbf16, #tpu.memory_space<vmem>>, vector<64x128xbf16>
    %c0_1 = arith.constant 0 : index
    %c0_2 = arith.constant 0 : index
    %7 = vector.load %arg6[%c0_1, %c0_2] : memref<128x64xbf16, #tpu.memory_space<vmem>>, vector<128x64xbf16>
    %cst = arith.constant dense<0.000000e+00> : vector<64x64xf32>
    %8 = tpu.matmul %6, %7, %cst {dimension_numbers = #tpu.dot_dimension_numbers<[1], [0], [0], [1], [0, 0, 1, 1], [], []>} : vector<64x128xbf16>, vector<128x64xbf16>, vector<64x64xf32> -> vector<64x64xf32>
    %c0_3 = arith.constant 0 : index
    %c0_4 = arith.constant 0 : index
    %c0_5 = arith.constant 0 : index
    %9 = vector.load %arg5[%c0_3, %c0_4, %c0_5] : memref<1x64x64xf32, #tpu.memory_space<vmem>>, vector<1x64x64xf32>
    %10 = vector.shape_cast %9 : vector<1x64x64xf32> to vector<64x64xf32>
    %11 = vector.shape_cast %8 : vector<64x64xf32> to vector<1x64x64xf32>
    tpu.vector_store %arg5[%c0_3, %c0_4, %c0_5], %11 {strides = array<i32>} : memref<1x64x64xf32, #tpu.memory_space<vmem>>, vector<1x64x64xf32>,
    return
  }
  func.func @transform_0(%arg0: i32, %arg1: i32) -> (i32, i32, i32) {
    %c0_i32 = arith.constant 0 : i32
    %c0_i32_0 = arith.constant 0 : i32
    %c0_i32_1 = arith.constant 0 : i32
    return %arg0, %c0_i32, %c0_i32_0 : i32, i32, i32
  }
  func.func @transform_1(%arg0: i32, %arg1: i32) -> (i32, i32, i32) {
    %c0_i32 = arith.constant 0 : i32
    %c0_i32_0 = arith.constant 0 : i32
    %c0_i32_1 = arith.constant 0 : i32
    return %arg0, %c0_i32, %c0_i32_0 : i32, i32, i32
  }
  func.func @transform_2(%arg0: i32, %arg1: i32) -> (i32, i32) {
    %c0_i32 = arith.constant 0 : i32
    %c0_i32_0 = arith.constant 0 : i32
    %c0_i32_1 = arith.constant 0 : i32
    return %c0_i32, %c0_i32_0 : i32, i32
  }
  func.func @transform_3(%arg0: i32, %arg1: i32) -> (i32, i32, i32) {
    %c0_i32 = arith.constant 0 : i32
    %c0_i32_0 = arith.constant 0 : i32
    return %arg0, %arg1, %c0_i32 : i32, i32, i32
  }
}

</mosaic_0001>

<bundles_post_ra>
// kernel: tpu_custom_call.1
= control target key start
LH: loop header
LB: loop body
LE: loop exit
PB: predicated region body
PF: predicated region fallthrough
CT: control target
= control target key end

     0   :  { %s755_s12 = smov 0   ;;  %s757_s13 = smov 0   ;;  %s887_s0 = inlined_call_operand.vmem [shape: f32[2,128,64], index: 0, kind: input, shape index: {}]   ;;  %s888_s1 = inlined_call_operand.vmem [shape: f32[2,128,64], index: 1, kind: input, shape index: {}]   ;;  %s889_s2 = inlined_call_operand.vmem [shape: bf16[128,128], index: 2, kind: input, shape index: {}]   ;;  %s890_s3 = inlined_call_operand.vmem [shape: f32[2,128,64], index: 3, kind: output, shape index: {}]  }
   0x1   :  { %s759_s14 = smov 0   ;;  %s761_s15 = smov 0  }
   0x2   :  { %s763_s16 = smov 0  }
   0x3 LB: > { %s22_s17 = sadd.s32 1, %s725_s14  ;;  %s25_s18 = sadd.s32 1, %s729_s15  ;;  %s733_s16 = sphi %s763_s16, %s13_s16   ;;  %s729_s15 = sphi %s761_s15, %s894_s15   ;;  %s725_s14 = sphi %s759_s14, %s893_s14   ;;  %s721_s13 = sphi %s757_s13, %s892_s13   ;;  %s717_s12 = sphi %s755_s12, %s891_s12  }
   0x4   : > { %p23_p0 = scmp.ge.s32.totalorder %s22_s17, 2  ;;  %p556_p1 = scmp.ge.s32.totalorder %s733_s16, 1 }
   0x5   : > { %p161_p2 = scmp.lt.s32.totalorder %s733_s16, 5 }
   0x6   : > { %s896_s17 = smov (%p23_p0, %s22_s17), 0  ;;  %s898_s18 = smov (!%p23_p0, %s25_s18), %s729_s15 }
   0x7   : > { %p162_p3 = pnand %p556_p1, %p161_p2  ;;  %p27_p4 = scmp.ge.s32.totalorder %s898_s18, 2 }
   0x8   : > { %p194_p5 = scmp.lt.s32.totalorder (!%p162_p3), %s721_s13, 1  ;;  %s561_s19 = sshll.u32 (!%p162_p3), %s717_s12, 3 }
   0x9   : > { %s900_s18 = smov (%p27_p4, %s898_s18), 0  ;;  %165 = sbr.rel (%p162_p3) target bundleno = 227 (0xe3), region = 32 }
   0xa   : > { %p207_p6 = scmp.lt.s32.totalorder (!%p162_p3), %s561_s19, 15  ;;  %p564_p7 = scmp.ne.s32.totalorder (!%p162_p3), %s717_s12, 0 }
   0xe   : > { %s902_s13 = smov (!%p194_p5, %s721_s13), 1  ;;  %s904_s19 = smov (!%p207_p6, %s561_s19), 15 }
   0xf   : > { %s617_s20 = sshll.u32 %s902_s13, 7  ;;  %s562_s21 = sshll.u32 %s902_s13, 4 }
  0x10   : > { %s791_s24 = scalar_lea.vmem %s887_s0, %s617_s20  ;;  %s796_s27 = scalar_lea.vmem %s888_s1, %s617_s20 }
  0x11   : > { %s210_s28 = sadd.s32 %s562_s21, %s904_s19  ;;  %217 = sbr.rel (%p564_p7) target bundleno = 46 (0x2e), region = 36 }
  0x12   : > { %s563_s29 = sshll.u32 %s210_s28, 3 }
  0x13   : > { %s801_s5 = scalar_lea.vmem %s890_s3, %s563_s29 }
  0x16   : > { %v218_v0 = vld [vmem:[%s791_s24] sm:$0xff]  ;;  %v219_v2 = vld [vmem:[%s791_s24 + $0x8] sm:$0xff]  ;;  %v220_v5 = vld [vmem:[%s791_s24 + $0x10] sm:$0xff]  ;;  %vm298_vm0 = vcmask 519168  }
  0x17   : > { %v234_v1 = vld [vmem:[%s796_s27] sm:$0xff]  ;;  %v235_v4 = vld [vmem:[%s796_s27 + $0x8] sm:$0xff]  ;;  %v236_v6 = vld [vmem:[%s796_s27 + $0x10] sm:$0xff] }
  0x18   : > { %v250_v3 = vadd.f32 %v234_v1, %v218_v0  ;;  %v251_v7 = vadd.f32 %v235_v4, %v219_v2  ;;  %v252_v8 = vadd.f32 %v236_v6, %v220_v5  ;;  %v221_v9 = vld [vmem:[%s791_s24 + $0x18] sm:$0xff]  ;;  %v222_v11 = vld [vmem:[%s791_s24 + $0x20] sm:$0xff]  ;;  %v223_v15 = vld [vmem:[%s791_s24 + $0x28] sm:$0xff] }
  0x19   : > { %v237_v10 = vld [vmem:[%s796_s27 + $0x18] sm:$0xff]  ;;  %v238_v14 = vld [vmem:[%s796_s27 + $0x20] sm:$0xff]  ;;  %v239_v16 = vld [vmem:[%s796_s27 + $0x28] sm:$0xff] }
  0x1a   : > { %v266_v12 = vmax.f32 %v250_v3, 0.0  ;;  %v253_v13 = vadd.f32 %v237_v10, %v221_v9  ;;  %v267_v17 = vmax.f32 %v251_v7, 0.0  ;;  %v268_v18 = vmax.f32 %v252_v8, 0.0  ;;  %v224_v21 = vld [vmem:[%s791_s24 + $0x30] sm:$0xff]  ;;  %v225_v23 = vld [vmem:[%s791_s24 + $0x38] sm:$0xff]  ;;  %v226_v28 = vld [vmem:[%s791_s24 + $0x40] sm:$0xff] }
  0x1b   : > { %v254_v19 = vadd.f32 %v238_v14, %v222_v11  ;;  %v255_v20 = vadd.f32 %v239_v16, %v223_v15  ;;  %v240_v22 = vld [vmem:[%s796_s27 + $0x30] sm:$0xff]  ;;  %v241_v27 = vld [vmem:[%s796_s27 + $0x38] sm:$0xff]  ;;  %v242_v29 = vld [vmem:[%s796_s27 + $0x40] sm:$0xff] }
  0x1c   : > { %v282_v24 = vpack.c.bf16 %v266_v12, %v266_v12  ;;  %v269_v25 = vmax.f32 %v253_v13, 0.0  ;;  %v256_v26 = vadd.f32 %v240_v22, %v224_v21  ;;  %v283_v30 = vpack.c.bf16 %v267_v17, %v267_v17  ;;  %v227_v34 = vld [vmem:[%s791_s24 + $0x48] sm:$0xff]  ;;  %v228_v36 = vld [vmem:[%s791_s24 + $0x50] sm:$0xff]  ;;  %v229_v42 = vld [vmem:[%s791_s24 + $0x58] sm:$0xff] }
  0x1d   : > { %v284_v31 = vpack.c.bf16 %v268_v18, %v268_v18  ;;  %v270_v32 = vmax.f32 %v254_v19, 0.0  ;;  %v271_v33 = vmax.f32 %v255_v20, 0.0  ;;  %v243_v35 = vld [vmem:[%s796_s27 + $0x48] sm:$0xff]  ;;  %v257_v39 = vadd.f32 %v241_v27, %v225_v23  ;;  %v244_v41 = vld [vmem:[%s796_s27 + $0x50] sm:$0xff]  ;;  %v245_v43 = vld [vmem:[%s796_s27 + $0x58] sm:$0xff] }
  0x1e   : > { %299 = vst.msk [vmem:[#allocation2] sm:$0xf] %vm298_vm0, %v282_v24  ;;  %v285_v37 = vpack.c.bf16 %v269_v25, %v269_v25  ;;  %v272_v38 = vmax.f32 %v256_v26, 0.0  ;;  %v258_v40 = vadd.f32 %v242_v29, %v226_v28  ;;  %v259_v46 = vadd.f32 %v243_v35, %v227_v34  ;;  %v230_v48 = vld [vmem:[%s791_s24 + $0x60] sm:$0xff]  ;;  %v231_v50 = vld [vmem:[%s791_s24 + $0x68] sm:$0xff]  ;;  %v232_v56 = vld [vmem:[%s791_s24 + $0x70] sm:$0xff] }
  0x1f   : > { %300 = vst.msk [vmem:[#allocation2 + $0x4] sm:$0xf] %vm298_vm0, %v283_v30  ;;  %v286_v44 = vpack.c.bf16 %v270_v32, %v270_v32  ;;  %v287_v45 = vpack.c.bf16 %v271_v33, %v271_v33  ;;  %v260_v47 = vadd.f32 %v244_v41, %v228_v36  ;;  %v246_v49 = vld [vmem:[%s796_s27 + $0x60] sm:$0xff]  ;;  %v273_v52 = vmax.f32 %v257_v39, 0.0  ;;  %v247_v55 = vld [vmem:[%s796_s27 + $0x68] sm:$0xff]  ;;  %v248_v61 = vld [vmem:[%s796_s27 + $0x70] sm:$0xff] }
  0x20   : > { %301 = vst.msk [vmem:[#allocation2 + $0x8] sm:$0xf] %vm298_vm0, %v284_v31  ;;  %v288_v51 = vpack.c.bf16 %v272_v38, %v272_v38  ;;  %v274_v53 = vmax.f32 %v258_v40, 0.0  ;;  %v261_v54 = vadd.f32 %v245_v43, %v229_v42  ;;  %v275_v57 = vmax.f32 %v259_v46, 0.0  ;;  %v233_v62 = vld [vmem:[%s791_s24 + $0x78] sm:$0xff] }
  0x21   : > { %302 = vst.msk [vmem:[#allocation2 + $0xc] sm:$0xf] %vm298_vm0, %v285_v37  ;;  %v276_v58 = vmax.f32 %v260_v47, 0.0  ;;  %v262_v59 = vadd.f32 %v246_v49, %v230_v48  ;;  %v263_v60 = vadd.f32 %v247_v55, %v231_v50  ;;  %v289_v63 = vpack.c.bf16 %v273_v52, %v273_v52  ;;  %v249_v3 = vld [vmem:[%s796_s27 + $0x78] sm:$0xff] }
  0x22   : > { %303 = vst.msk [vmem:[#allocation2 + $0x10] sm:$0xf] %vm298_vm0, %v286_v44  ;;  %v290_v0 = vpack.c.bf16 %v274_v53, %v274_v53  ;;  %v277_v1 = vmax.f32 %v261_v54, 0.0  ;;  %v264_v2 = vadd.f32 %v248_v61, %v232_v56  ;;  %v291_v4 = vpack.c.bf16 %v275_v57, %v275_v57 }
  0x23   : > { %304 = vst.msk [vmem:[#allocation2 + $0x14] sm:$0xf] %vm298_vm0, %v287_v45  ;;  %v278_v5 = vmax.f32 %v262_v59, 0.0  ;;  %v279_v6 = vmax.f32 %v263_v60, 0.0  ;;  %v292_v7 = vpack.c.bf16 %v276_v58, %v276_v58  ;;  %v265_v9 = vadd.f32 %v249_v3, %v233_v62 }
  0x24   : > { %305 = vst.msk [vmem:[#allocation2 + $0x18] sm:$0xf] %vm298_vm0, %v288_v51  ;;  %v280_v8 = vmax.f32 %v264_v2, 0.0  ;;  %v293_v10 = vpack.c.bf16 %v277_v1, %v277_v1 }
  0x25   : > { %306 = vst.msk [vmem:[#allocation2 + $0x1c] sm:$0xf] %vm298_vm0, %v289_v63  ;;  %v294_v11 = vpack.c.bf16 %v278_v5, %v278_v5  ;;  %v281_v12 = vmax.f32 %v265_v9, 0.0  ;;  %v295_v13 = vpack.c.bf16 %v279_v6, %v279_v6 }
  0x26   : > { %307 = vst.msk [vmem:[#allocation2 + $0x20] sm:$0xf] %vm298_vm0, %v290_v0  ;;  %v296_v14 = vpack.c.bf16 %v280_v8, %v280_v8 }
  0x27   : > { %308 = vst.msk [vmem:[#allocation2 + $0x24] sm:$0xf] %vm298_vm0, %v291_v4  ;;  %v297_v15 = vpack.c.bf16 %v281_v12, %v281_v12 }
  0x28   : > { %309 = vst.msk [vmem:[#allocation2 + $0x28] sm:$0xf] %vm298_vm0, %v292_v7 }
  0x29   : > { %310 = vst.msk [vmem:[#allocation2 + $0x2c] sm:$0xf] %vm298_vm0, %v293_v10 }
  0x2a   : > { %311 = vst.msk [vmem:[#allocation2 + $0x30] sm:$0xf] %vm298_vm0, %v294_v11 }
  0x2b   : > { %312 = vst.msk [vmem:[#allocation2 + $0x34] sm:$0xf] %vm298_vm0, %v295_v13 }
  0x2c   : > { %313 = vst.msk [vmem:[#allocation2 + $0x38] sm:$0xf] %vm298_vm0, %v296_v14 }
  0x2d   : > { %314 = vst.msk [vmem:[#allocation2 + $0x3c] sm:$0xf] %vm298_vm0, %v297_v15 }
  0x2e PF: > { %v627_v19 = vld [vmem:[#allocation2 + $0x20] sm:$0xff]  ;;  %v626_v20 = vld [vmem:[#allocation2 + $0x18] sm:$0xff]  ;;  %s565_s6 = sshll.u32 %s717_s12, 6  ;;  %v625_v21 = vld [vmem:[#allocation2 + $0x10] sm:$0xff]  ;;  %vm445_vm1 = vcmask 523264  }
  0x2f   : > { %s316_s7 = sshra.s32 %s565_s6, 3  ;;  %v624_v22 = vld [vmem:[#allocation2 + $0x8] sm:$0xff]  ;;  %v623_v23 = vld [vmem:[#allocation2] sm:$0xff] }
  0x30   : > { %v628_v18 = vld [vmem:[#allocation2 + $0x28] sm:$0xff]  ;;  %s566_s8 = sshll.u32 %s316_s7, 2 }
  0x31   : > { %s319_s11 = scalar_lea.vmem %s889_s2, %s566_s8 }
  0x32   : > { %v629_v17 = vld [vmem:[#allocation2 + $0x30] sm:$0xff]  ;;  %v619_v24 = vld [vmem:[%s319_s11] sm:$0xff]  ;;  %v620_v25 = vld [vmem:[%s319_s11 + $0x8] sm:$0xff] }
  0x33   : > { %v621_v26 = vld [vmem:[%s319_s11 + $0x10] sm:$0xff]  ;;  %v622_v27 = vld [vmem:[%s319_s11 + $0x18] sm:$0xff] }
  0x34   : > { %v630_v16 = vld [vmem:[#allocation2 + $0x38] sm:$0xff] }
  0x35   : > { %416 = vmatpush.bf16.msra.mxu0 %v630_v16  ;;  %631 = vmatpush.bf16.msra.mxu1 %v630_v16 }
  0x36   : > { %632 = vmatpush.bf16.msra.mxu2 %v630_v16  ;;  %633 = vmatpush.bf16.msra.mxu3 %v630_v16 }
  0x39   : > { %417 = vmatpush.bf16.msra.mxu0 %v629_v17  ;;  %634 = vmatpush.bf16.msra.mxu1 %v629_v17 }
  0x3a   : > { %635 = vmatpush.bf16.msra.mxu2 %v629_v17  ;;  %636 = vmatpush.bf16.msra.mxu3 %v629_v17 }
  0x3d   : > { %418 = vmatpush.bf16.msra.mxu0 %v628_v18  ;;  %637 = vmatpush.bf16.msra.mxu1 %v628_v18 }
  0x3e   : > { %638 = vmatpush.bf16.msra.mxu2 %v628_v18  ;;  %639 = vmatpush.bf16.msra.mxu3 %v628_v18 }
  0x41   : > { %419 = vmatpush.bf16.msra.mxu0 %v627_v19  ;;  %640 = vmatpush.bf16.msra.mxu1 %v627_v19 }
  0x42   : > { %641 = vmatpush.bf16.msra.mxu2 %v627_v19  ;;  %642 = vmatpush.bf16.msra.mxu3 %v627_v19 }
  0x45   : > { %420 = vmatpush.bf16.msra.mxu0 %v626_v20  ;;  %643 = vmatpush.bf16.msra.mxu1 %v626_v20 }
  0x46   : > { %644 = vmatpush.bf16.msra.mxu2 %v626_v20  ;;  %645 = vmatpush.bf16.msra.mxu3 %v626_v20 }
  0x49   : > { %421 = vmatpush.bf16.msra.mxu0 %v625_v21  ;;  %646 = vmatpush.bf16.msra.mxu1 %v625_v21 }
  0x4a   : > { %647 = vmatpush.bf16.msra.mxu2 %v625_v21  ;;  %648 = vmatpush.bf16.msra.mxu3 %v625_v21 }
  0x4d   : > { %422 = vmatpush.bf16.msra.mxu0 %v624_v22  ;;  %649 = vmatpush.bf16.msra.mxu1 %v624_v22 }
  0x4e   : > { %650 = vmatpush.bf16.msra.mxu2 %v624_v22  ;;  %651 = vmatpush.bf16.msra.mxu3 %v624_v22 }
  0x51   : > { %423 = vmatpush.bf16.msra.mxu0 %v623_v23  ;;  %652 = vmatpush.bf16.msra.mxu1 %v623_v23 }
  0x52   : > { %653 = vmatpush.bf16.msra.mxu2 %v623_v23  ;;  %654 = vmatpush.bf16.msra.mxu3 %v623_v23 }
  0x54   : > { %424 = vmatmul.bf16.vlgmr.msra.gmra.mxu0 %v619_v24  ;;  %429 = vmatmul.bf16.vlgmr.msra.gmra.mxu1 %v620_v25 }
  0x55   : > { %434 = vmatmul.bf16.vlgmr.msra.gmra.mxu2 %v621_v26  ;;  %439 = vmatmul.bf16.vlgmr.msra.gmra.mxu3 %v622_v27 }
  0xd1   : > { %v425_v28 = vpop.f32.mrf.mxu0  ;;  %v430_v29 = vpop.f32.mrf.mxu1 }
  0xd2   : > { %446 = vst.msk [vmem:[%s801_s5] sm:$0xff] %vm445_vm1, %v425_v28 }
  0xd3   : > { %448 = vst.msk [vmem:[%s801_s5 + $0x10] sm:$0xff] %vm445_vm1, %v430_v29 }
  0xd8   : > { %v435_v30 = vpop.f32.mrf.mxu2  ;;  %v440_v31 = vpop.f32.mrf.mxu3 }
  0xd9   : > { %450 = vst.msk [vmem:[%s801_s5 + $0x20] sm:$0xff] %vm445_vm1, %v435_v30  ;;  %v427_v32 = vpop.f32.mrf.mxu0  ;;  %v432_v33 = vpop.f32.mrf.mxu1 }
  0xda   : > { %452 = vst.msk [vmem:[%s801_s5 + $0x30] sm:$0xff] %vm445_vm1, %v440_v31 }
  0xdb   : > { %447 = vst.msk [vmem:[%s801_s5 + $0x8] sm:$0xff] %vm445_vm1, %v427_v32 }
  0xdc   : > { %449 = vst.msk [vmem:[%s801_s5 + $0x18] sm:$0xff] %vm445_vm1, %v432_v33 }
  0xe0   : > { %v437_v34 = vpop.f32.mrf.mxu2  ;;  %v442_v35 = vpop.f32.mrf.mxu3 }
  0xe1   : > { %451 = vst.msk [vmem:[%s801_s5 + $0x28] sm:$0xff] %vm445_vm1, %v437_v34 }
  0xe2   : > { %453 = vst.msk [vmem:[%s801_s5 + $0x38] sm:$0xff] %vm445_vm1, %v442_v35 }
  0xe3 PF: > { %s13_s16 = sadd.s32 1, %s733_s16   ;;  %s891_s12 = smov %s725_s14 }
  0xe4   : > { %p10_p8 = scmp.ge.s32.totalorder %s13_s16, 6   ;;  %s892_s13 = smov %s729_s15 }
  0xe5   : > { %s893_s14 = smov %s896_s17  ;;  %s894_s15 = smov %s900_s18 }
  0xe6   :  { %12 = sbr.rel (!%p10_p8) target bundleno = 3 (0x3), region = 70 }

</bundles_post_ra>
